<compile_context>
chip_gen: v5e
topology: v5e:2x2
jax: 0.10.0
libtpu: 0.0.40
codegen_flags: <defaults>
</compile_context>

<pallas_src>
import numpy as np
import jax
import jax.numpy as jnp
from jax.experimental import pallas as pl
from jax.experimental.pallas import tpu as pltpu


EPS = 1e-3  # LayerNormalization default eps


def _mle_kernel_partitioned(idx_ref, content_ref, pos_ref, a2c_ref, a2t_ref,
                            b2c_ref, b2t_ref, out_ref):
    # idx_ref: (tile_t, 1) int32, content_ref: (tile_t, d_content),
    # pos_ref: (max_len, d_positional), params: (1, d_*), out: (tile_t, d_model)
    c = content_ref[...].astype(jnp.float32)
    table = pos_ref[...].astype(jnp.float32)
    idx = idx_ref[...]
    tile_t, d_content = c.shape
    max_len, d_pos = table.shape

    # Fused timing gather: one-hot(idx) @ position_table on the MXU.
    onehot = (idx == jax.lax.broadcasted_iota(jnp.int32, (tile_t, max_len), 1)
              ).astype(jnp.float32)
    t = jnp.dot(onehot, table, preferred_element_type=jnp.float32)  # (tile_t, d_pos)

    # LayerNorm stats over the (virtual) concatenated feature axis, computed
    # from partial sums of the two halves -> no lane concat / relayout.
    n = d_content + d_pos
    total = jnp.sum(c, axis=-1, keepdims=True) + jnp.sum(t, axis=-1, keepdims=True)
    mu = total * (1.0 / n)
    cc = c - mu
    tc = t - mu
    ss = (jnp.sum(cc * cc, axis=-1, keepdims=True)
          + jnp.sum(tc * tc, axis=-1, keepdims=True))
    sigma = jnp.sqrt(ss * (1.0 / (n - 1)))      # unbiased std (torch.std, ddof=1)
    inv = 1.0 / (sigma + EPS)

    out_ref[:, :d_content] = (cc * inv * a2c_ref[...] + b2c_ref[...]).astype(out_ref.dtype)
    out_ref[:, d_content:] = (tc * inv * a2t_ref[...] + b2t_ref[...]).astype(out_ref.dtype)


def _mle_kernel_added(idx_ref, content_ref, pos_ref, a2_ref, b2_ref, out_ref):
    c = content_ref[...].astype(jnp.float32)
    table = pos_ref[...].astype(jnp.float32)
    idx = idx_ref[...]
    tile_t, d = c.shape
    max_len = table.shape[0]

    onehot = (idx == jax.lax.broadcasted_iota(jnp.int32, (tile_t, max_len), 1)
              ).astype(jnp.float32)
    t = jnp.dot(onehot, table, preferred_element_type=jnp.float32)

    x = c + t
    mu = jnp.mean(x, axis=-1, keepdims=True)
    xc = x - mu
    sigma = jnp.sqrt(jnp.sum(xc * xc, axis=-1, keepdims=True) * (1.0 / (d - 1)))
    y = xc / (sigma + EPS)
    out_ref[...] = (y * a2_ref[...] + b2_ref[...]).astype(out_ref.dtype)


def _round_up(x, m):
    return ((x + m - 1) // m) * m


def _pick_tile_t(tile_t, T, d_content, d_positional, d_model, max_len, itemsize,
                 vmem_budget_bytes):
    """Largest multiple of 8 <= tile_t that fits the (rough) VMEM budget."""
    # Double-buffered streamed refs (idx, content, out) + f32 temporaries.
    per_row = (2 * (4 + d_content * itemsize + d_model * itemsize)
               + 4 * (d_content + 2 * d_positional + d_model + max_len + 8))
    fixed = 2 * max_len * d_positional * 4 + 8 * d_model * 4
    budget = max(vmem_budget_bytes - fixed, 1 << 20)
    cap = max(8, (budget // per_row) // 8 * 8)
    tile = min(tile_t, cap, _round_up(T, 8))
    return max(8, (tile // 8) * 8)


def multi_level_embedding(content, pos_idx, position_table, a2, b2, *,
                          partitioned, tile_t=2048, vmem_budget_bytes=48 << 20):
    """content: (T, d_content); pos_idx: (T,) int32 position-in-sequence;
    position_table: (max_len, d_positional); a2/b2: (d_model,)."""
    T, d_content = content.shape
    max_len, d_positional = position_table.shape
    d_model = d_content + d_positional if partitioned else d_content
    if not partitioned:
        assert d_positional == d_content
    assert a2.shape == (d_model,) and b2.shape == (d_model,)

    itemsize = jnp.dtype(content.dtype).itemsize
    tile_t = _pick_tile_t(tile_t, T, d_content, d_positional, d_model, max_len,
                          itemsize, vmem_budget_bytes)
    T_pad = _round_up(T, tile_t)
    if T_pad != T:
        content = jnp.pad(content, ((0, T_pad - T), (0, 0)))
        pos_idx = jnp.pad(pos_idx, ((0, T_pad - T),))
    idx2d = pos_idx.reshape(T_pad, 1).astype(jnp.int32)

    a2 = a2.astype(jnp.float32)
    b2 = b2.astype(jnp.float32)
    if partitioned:
        kernel = _mle_kernel_partitioned
        params = (a2[:d_content].reshape(1, d_content),
                  a2[d_content:].reshape(1, d_positional),
                  b2[:d_content].reshape(1, d_content),
                  b2[d_content:].reshape(1, d_positional))
        param_specs = [pl.BlockSpec((1, d_content), lambda i: (0, 0)),
                       pl.BlockSpec((1, d_positional), lambda i: (0, 0)),
                       pl.BlockSpec((1, d_content), lambda i: (0, 0)),
                       pl.BlockSpec((1, d_positional), lambda i: (0, 0))]
    else:
        kernel = _mle_kernel_added
        params = (a2.reshape(1, d_model), b2.reshape(1, d_model))
        param_specs = [pl.BlockSpec((1, d_model), lambda i: (0, 0)),
                       pl.BlockSpec((1, d_model), lambda i: (0, 0))]

    cost = pl.CostEstimate(
        flops=int(T_pad) * (6 * d_model + 2 * max_len * d_positional),
        transcendentals=int(T_pad),
        bytes_accessed=int(T_pad) * (d_content * itemsize + 4 + d_model * itemsize)
                       + max_len * d_positional * 4,
    )

    out = pl.pallas_call(
        kernel,
        out_shape=jax.ShapeDtypeStruct((T_pad, d_model), content.dtype),
        grid=(T_pad // tile_t,),
        in_specs=[
            pl.BlockSpec((tile_t, 1), lambda i: (i, 0)),                 # pos idx
            pl.BlockSpec((tile_t, d_content), lambda i: (i, 0)),         # content
            pl.BlockSpec((max_len, d_positional), lambda i: (0, 0)),     # pos table
            *param_specs,                                                # a2/b2
        ],
        out_specs=pl.BlockSpec((tile_t, d_model), lambda i: (i, 0)),
        compiler_params=pltpu.CompilerParams(
            dimension_semantics=("parallel",),
            vmem_limit_bytes=min(vmem_budget_bytes + (8 << 20), 96 << 20),
        ),
        cost_estimate=cost,
    )(idx2d, content, position_table, *params)

    return out[:T] if T_pad != T else out


def build_position_indices(seq_lens):
    # timing_signal row r uses position_table[position-within-sequence(r)]
    return np.concatenate([np.arange(L, dtype=np.int32) for L in seq_lens])


def reference_forward(content, timing, a2, b2, partitioned):
    # Pure-JAX reference of the eval-mode PyTorch forward (for verification).
    if partitioned:
        x = jnp.concatenate([content, timing], axis=1)
    else:
        x = content + timing
    mu = jnp.mean(x, axis=-1, keepdims=True)
    sigma = jnp.sqrt(jnp.sum((x - mu) ** 2, axis=-1, keepdims=True) / (x.shape[-1] - 1))
    y = (x - mu) / (sigma + EPS)
    return y * a2[None, :] + b2[None, :]


if __name__ == "__main__":
    key = jax.random.PRNGKey(0)
    k_pos, k_content, k_pos2, k_content2 = jax.random.split(key, 4)

    # --- Case 1: partitioned (d_model=32 -> d_content=d_positional=16) -------
    d_model = 32
    d_positional = d_model // 2
    d_content = d_model - d_positional
    max_len = 16
    seq_lens = [5, 8, 3]            # batch of 3 packed sequences, T = 16
    T = int(sum(seq_lens))

    position_table = jax.random.normal(k_pos, (max_len, d_positional), jnp.float32)
    a2 = jnp.ones((d_model,), jnp.float32)     # LayerNormalization.a_2
    b2 = jnp.zeros((d_model,), jnp.float32)    # LayerNormalization.b_2
    extra_content_annotations = jax.random.normal(k_content, (T, d_content), jnp.float32)

    content_annotations = extra_content_annotations  # eval-mode FeatureDropout == id
    pos_idx = jnp.asarray(build_position_indices(seq_lens))

    annotations = multi_level_embedding(content_annotations, pos_idx, position_table,
                                        a2, b2, partitioned=True)
    annotations = jax.block_until_ready(annotations)

    ref = reference_forward(content_annotations, position_table[pos_idx],
                            a2, b2, True)
    np.testing.assert_allclose(np.asarray(annotations), np.asarray(ref),
                               rtol=1e-5, atol=1e-5)

    # --- Case 2: non-partitioned, T not a tile multiple (exercises padding) ---
    d_model2 = 32
    max_len2 = 16
    seq_lens2 = [7, 6]              # T = 13 -> padded to 16 inside the wrapper
    T2 = int(sum(seq_lens2))
    position_table2 = jax.random.normal(k_pos2, (max_len2, d_model2), jnp.float32)
    a2b = jax.random.normal(jax.random.PRNGKey(1), (d_model2,), jnp.float32)
    b2b = jax.random.normal(jax.random.PRNGKey(2), (d_model2,), jnp.float32)
    content2 = jax.random.normal(k_content2, (T2, d_model2), jnp.float32)
    pos_idx2 = jnp.asarray(build_position_indices(seq_lens2))

    out2 = multi_level_embedding(content2, pos_idx2, position_table2, a2b, b2b,
                                 partitioned=False)
    out2 = jax.block_until_ready(out2)
    ref2 = reference_forward(content2, position_table2[pos_idx2], a2b, b2b, False)
    np.testing.assert_allclose(np.asarray(out2), np.asarray(ref2),
                               rtol=1e-5, atol=1e-5)

    # module returns (annotations, content_annotations, batch_idxs)
    _outputs = (annotations, content_annotations, seq_lens)
    print("KERNEL_OK")
</pallas_src>

<mosaic_0001>
module attributes {stable_mosaic.version = 11 : i64} {
  func.func @_mle_kernel_partitioned(%arg0: i32, %arg1: memref<16x1xi32, #tpu.memory_space<vmem>>, %arg2: memref<16x16xf32, #tpu.memory_space<vmem>>, %arg3: memref<16x16xf32, #tpu.memory_space<vmem>>, %arg4: memref<1x16xf32, #tpu.memory_space<vmem>>, %arg5: memref<1x16xf32, #tpu.memory_space<vmem>>, %arg6: memref<1x16xf32, #tpu.memory_space<vmem>>, %arg7: memref<1x16xf32, #tpu.memory_space<vmem>>, %arg8: memref<16x32xf32, #tpu.memory_space<vmem>>) attributes {dimension_semantics = [#tpu.dimension_semantics<parallel>], iteration_bounds = array<i64: 1>, scalar_prefetch = 0 : i64, scratch_operands = 0 : i64, tpu.core_type = #tpu.core_type<tc>, window_params = [{transform_indices = @transform_0, window_bounds = array<i64: 16, 1>}, {transform_indices = @transform_1, window_bounds = array<i64: 16, 16>}, {pipeline_mode = #tpu.pipeline_mode<synchronous>, transform_indices = @transform_2, window_bounds = array<i64: 16, 16>}, {pipeline_mode = #tpu.pipeline_mode<synchronous>, transform_indices = @transform_3, window_bounds = array<i64: 1, 16>}, {pipeline_mode = #tpu.pipeline_mode<synchronous>, transform_indices = @transform_4, window_bounds = array<i64: 1, 16>}, {pipeline_mode = #tpu.pipeline_mode<synchronous>, transform_indices = @transform_5, window_bounds = array<i64: 1, 16>}, {pipeline_mode = #tpu.pipeline_mode<synchronous>, transform_indices = @transform_6, window_bounds = array<i64: 1, 16>}, {transform_indices = @transform_7, window_bounds = array<i64: 16, 32>}]} {
    %c0 = arith.constant 0 : index
    %c0_0 = arith.constant 0 : index
    %0 = vector.load %arg2[%c0, %c0_0] : memref<16x16xf32, #tpu.memory_space<vmem>>, vector<16x16xf32>
    %c0_1 = arith.constant 0 : index
    %c0_2 = arith.constant 0 : index
    %1 = vector.load %arg3[%c0_1, %c0_2] : memref<16x16xf32, #tpu.memory_space<vmem>>, vector<16x16xf32>
    %c0_3 = arith.constant 0 : index
    %c0_4 = arith.constant 0 : index
    %2 = vector.load %arg1[%c0_3, %c0_4] : memref<16x1xi32, #tpu.memory_space<vmem>>, vector<16x1xi32>
    %3 = tpu.iota {dimensions = array<i32: 1>} : vector<16x16xi32>
    %4 = vector.broadcast %2 : vector<16x1xi32> to vector<16x16xi32>
    %5 = arith.cmpi eq, %4, %3 : vector<16x16xi32>
    %6 = arith.extui %5 : vector<16x16xi1> to vector<16x16xi32>
    %7 = arith.sitofp %6 : vector<16x16xi32> to vector<16x16xf32>
    %cst = arith.constant dense<0.000000e+00> : vector<16x16xf32>
    %8 = tpu.matmul %7, %1, %cst {dimension_numbers = #tpu.dot_dimension_numbers<[1], [0], [0], [1], [0, 0, 1, 1], [], []>} : vector<16x16xf32>, vector<16x16xf32>, vector<16x16xf32> -> vector<16x16xf32>
    %cst_5 = arith.constant dense<0.000000e+00> : vector<16xf32>
    %9 = vector.multi_reduction <add>, %0, %cst_5 [1] : vector<16x16xf32> to vector<16xf32>
    %10 = vector.shape_cast %9 : vector<16xf32> to vector<16x1xf32>
    %cst_6 = arith.constant dense<0.000000e+00> : vector<16xf32>
    %11 = vector.multi_reduction <add>, %8, %cst_6 [1] : vector<16x16xf32> to vector<16xf32>
    %12 = vector.shape_cast %11 : vector<16xf32> to vector<16x1xf32>
    %13 = arith.addf %10, %12 : vector<16x1xf32>
    %cst_7 = arith.constant 3.125000e-02 : f32
    %14 = vector.broadcast %cst_7 : f32 to vector<16x1xf32>
    %15 = arith.mulf %13, %14 : vector<16x1xf32>
    %16 = vector.broadcast %15 : vector<16x1xf32> to vector<16x16xf32>
    %17 = arith.subf %0, %16 : vector<16x16xf32>
    %18 = vector.broadcast %15 : vector<16x1xf32> to vector<16x16xf32>
    %19 = arith.subf %8, %18 : vector<16x16xf32>
    %20 = arith.mulf %17, %17 : vector<16x16xf32>
    %cst_8 = arith.constant dense<0.000000e+00> : vector<16xf32>
    %21 = vector.multi_reduction <add>, %20, %cst_8 [1] : vector<16x16xf32> to vector<16xf32>
    %22 = vector.shape_cast %21 : vector<16xf32> to vector<16x1xf32>
    %23 = arith.mulf %19, %19 : vector<16x16xf32>
    %cst_9 = arith.constant dense<0.000000e+00> : vector<16xf32>
    %24 = vector.multi_reduction <add>, %23, %cst_9 [1] : vector<16x16xf32> to vector<16xf32>
    %25 = vector.shape_cast %24 : vector<16xf32> to vector<16x1xf32>
    %26 = arith.addf %22, %25 : vector<16x1xf32>
    %cst_10 = arith.constant 0.0322580636 : f32
    %27 = vector.broadcast %cst_10 : f32 to vector<16x1xf32>
    %28 = arith.mulf %26, %27 : vector<16x1xf32>
    %29 = math.sqrt %28 : vector<16x1xf32>
    %cst_11 = arith.constant 1.000000e-03 : f32
    %30 = vector.broadcast %cst_11 : f32 to vector<16x1xf32>
    %31 = arith.addf %29, %30 : vector<16x1xf32>
    %cst_12 = arith.constant 1.000000e+00 : f32
    %32 = vector.broadcast %cst_12 : f32 to vector<16x1xf32>
    %33 = arith.divf %32, %31 : vector<16x1xf32>
    %34 = vector.broadcast %33 : vector<16x1xf32> to vector<16x16xf32>
    %35 = arith.mulf %17, %34 : vector<16x16xf32>
    %c0_13 = arith.constant 0 : index
    %c0_14 = arith.constant 0 : index
    %36 = vector.load %arg4[%c0_13, %c0_14] : memref<1x16xf32, #tpu.memory_space<vmem>>, vector<1x16xf32>
    %37 = vector.broadcast %36 : vector<1x16xf32> to vector<16x16xf32>
    %38 = arith.mulf %35, %37 : vector<16x16xf32>
    %c0_15 = arith.constant 0 : index
    %c0_16 = arith.constant 0 : index
    %39 = vector.load %arg6[%c0_15, %c0_16] : memref<1x16xf32, #tpu.memory_space<vmem>>, vector<1x16xf32>
    %40 = vector.broadcast %39 : vector<1x16xf32> to vector<16x16xf32>
    %41 = arith.addf %38, %40 : vector<16x16xf32>
    %c0_17 = arith.constant 0 : index
    %c0_18 = arith.constant 0 : index
    %42 = vector.load %arg8[%c0_17, %c0_18] : memref<16x32xf32, #tpu.memory_space<vmem>>, vector<16x16xf32>
    tpu.vector_store %arg8[%c0_17, %c0_18], %41 {strides = array<i32>} : memref<16x32xf32, #tpu.memory_space<vmem>>, vector<16x16xf32>,
    %43 = vector.broadcast %33 : vector<16x1xf32> to vector<16x16xf32>
    %44 = arith.mulf %19, %43 : vector<16x16xf32>
    %c0_19 = arith.constant 0 : index
    %c0_20 = arith.constant 0 : index
    %45 = vector.load %arg5[%c0_19, %c0_20] : memref<1x16xf32, #tpu.memory_space<vmem>>, vector<1x16xf32>
    %46 = vector.broadcast %45 : vector<1x16xf32> to vector<16x16xf32>
    %47 = arith.mulf %44, %46 : vector<16x16xf32>
    %c0_21 = arith.constant 0 : index
    %c0_22 = arith.constant 0 : index
    %48 = vector.load %arg7[%c0_21, %c0_22] : memref<1x16xf32, #tpu.memory_space<vmem>>, vector<1x16xf32>
    %49 = vector.broadcast %48 : vector<1x16xf32> to vector<16x16xf32>
    %50 = arith.addf %47, %49 : vector<16x16xf32>
    %c0_23 = arith.constant 0 : index
    %c16 = arith.constant 16 : index
    %51 = vector.load %arg8[%c0_23, %c16] : memref<16x32xf32, #tpu.memory_space<vmem>>, vector<16x16xf32>
    tpu.vector_store %arg8[%c0_23, %c16], %50 {strides = array<i32>} : memref<16x32xf32, #tpu.memory_space<vmem>>, vector<16x16xf32>,
    return
  }
  func.func @transform_0(%arg0: i32) -> (i32, i32) {
    %c0_i32 = arith.constant 0 : i32
    %c0_i32_0 = arith.constant 0 : i32
    return %arg0, %c0_i32 : i32, i32
  }
  func.func @transform_1(%arg0: i32) -> (i32, i32) {
    %c0_i32 = arith.constant 0 : i32
    %c0_i32_0 = arith.constant 0 : i32
    return %arg0, %c0_i32 : i32, i32
  }
  func.func @transform_2(%arg0: i32) -> (i32, i32) {
    %c0_i32 = arith.constant 0 : i32
    %c0_i32_0 = arith.constant 0 : i32
    %c0_i32_1 = arith.constant 0 : i32
    return %c0_i32, %c0_i32_0 : i32, i32
  }
  func.func @transform_3(%arg0: i32) -> (i32, i32) {
    %c0_i32 = arith.constant 0 : i32
    %c0_i32_0 = arith.constant 0 : i32
    %c0_i32_1 = arith.constant 0 : i32
    return %c0_i32, %c0_i32_0 : i32, i32
  }
  func.func @transform_4(%arg0: i32) -> (i32, i32) {
    %c0_i32 = arith.constant 0 : i32
    %c0_i32_0 = arith.constant 0 : i32
    %c0_i32_1 = arith.constant 0 : i32
    return %c0_i32, %c0_i32_0 : i32, i32
  }
  func.func @transform_5(%arg0: i32) -> (i32, i32) {
    %c0_i32 = arith.constant 0 : i32
    %c0_i32_0 = arith.constant 0 : i32
    %c0_i32_1 = arith.constant 0 : i32
    return %c0_i32, %c0_i32_0 : i32, i32
  }
  func.func @transform_6(%arg0: i32) -> (i32, i32) {
    %c0_i32 = arith.constant 0 : i32
    %c0_i32_0 = arith.constant 0 : i32
    %c0_i32_1 = arith.constant 0 : i32
    return %c0_i32, %c0_i32_0 : i32, i32
  }
  func.func @transform_7(%arg0: i32) -> (i32, i32) {
    %c0_i32 = arith.constant 0 : i32
    %c0_i32_0 = arith.constant 0 : i32
    return %arg0, %c0_i32 : i32, i32
  }
}

</mosaic_0001>

<bundles_post_ra>
// kernel: tpu_custom_call.1
= control target key start
LH: loop header
LB: loop body
LE: loop exit
PB: predicated region body
PF: predicated region fallthrough
CT: control target
= control target key end

     0   :  { %12 = vsyncpa [#allocation3], 0  ;;  %s442_s0 = inlined_call_operand.vmem [shape: s32[16,1], index: 0, kind: input, shape index: {}]   ;;  %s443_s1 = inlined_call_operand.vmem [shape: f32[16,16], index: 1, kind: input, shape index: {}]   ;;  %s444_s2 = inlined_call_operand.hbm [shape: f32[16,16], index: 2, kind: input, shape index: {}]   ;;  %s445_s3 = inlined_call_operand.vmem [shape: f32[1,16], index: 3, kind: input, shape index: {}]   ;;  %s446_s4 = inlined_call_operand.vmem [shape: f32[1,16], index: 4, kind: input, shape index: {}]   ;;  %s447_s5 = inlined_call_operand.vmem [shape: f32[1,16], index: 5, kind: input, shape index: {}]   ;;  %s448_s6 = inlined_call_operand.vmem [shape: f32[1,16], index: 6, kind: input, shape index: {}]   ;;  %s449_s7 = inlined_call_operand.hbm [shape: f32[16,32], index: 7, kind: output, shape index: {}]  }
   0x1   :  { %13 = vsyncpa [#allocation4], 0  ;;  %s22_s26 = sshll.u32 %s444_s2, 4  ;;  %s327_s27 = smov [#allocation2]   ;;  %s23_s26 = int_to_ptr.hbm [resolvable:$true] %s22_s26 }
   0x2   :  { %s24_s28 = sshll.u32 %s327_s27, 4  ;;  %s328_s29 = smov 128   ;;  %s25_s28 = int_to_ptr.vmem [resolvable:$true] %s24_s28 }
   0x3   :  { %s329_s30 = smov 8  }
   0x4   :  { %30 = dma.hbm_to_vmem [thread:$0]  %s23_s26, 256, %s25_s28, [#allocation3], %s328_s29, %s328_s29, %s329_s30  }
   0x5   :  { %323 = dma.done.wait [#allocation3], 256  }
   0x6   :  { %324 = vsyncadd [#allocation3], 4294967040  ;;  %v330_v0 = vmov 0   ;;  %v47_v1 = vld [vmem:[%s442_s0] sm:$0xff]  ;;  %v48_v2 = vld [vmem:[%s442_s0 + $0x8] sm:$0xff]  ;;  %v49_v5 = vlaneseq  ;;  %vm63_vm0 = vcmask 130048  }
   0x7   :  { %262 = vset.pattern.permute.xlu0 %v330_v0  ;;  %v46_v3 = vld [vmem:[#allocation2 + $0x8] sm:$0xff]  ;;  %v45_v4 = vld [vmem:[#allocation2] sm:$0xff]  ;;  %v331_v8 = vmov 0.0   ;;  %v43_v12 = vld [vmem:[%s443_s1] sm:$0xff]  ;;  %vm227_vm15 = vcmask 261248   ;;  %s236_s22 = sshll.u32 %s449_s7, 4  ;;  %s237_s22 = int_to_ptr.hbm [resolvable:$true] %s236_s22 }
   0x8   :  { %52 = vperm.xlu0 %262, %v47_v1   ;;  %84 = vmatpush.msra.mxu0 %v46_v3  ;;  %v50_v6 = vand.u32 127, %v49_v5  ;;  %v93_v13 = vsel %vm63_vm0, %v43_v12, 0.0  ;;  %v44_v14 = vld [vmem:[%s443_s1 + $0x8] sm:$0xff] }
   0x9   :  { %253 = vmatpush.msra.mxu1 %v46_v3  ;;  %94 = vadd.xlane.f32.xlu1 %v93_v13  ;;  %v96_v15 = vsel %vm63_vm0, %v44_v14, 0.0 }
   0xa   :  { %85 = vmatpush.msra.mxu0 %v45_v4 }
   0xb   :  { %254 = vmatpush.msra.mxu1 %v45_v4 }
  0x10   :  { %55 = vperm.xlu0 %262, %v48_v2  }
  0x11   :  { %97 = vadd.xlane.f32.xlu1 %v96_v15  ;;  %v263_v15 = vld [vmem:[%s445_s3] ss:$0 sm:$0xff]  ;;  %s332_s3 = smov 16  }
  0x7a   :  { %v53_v7 = vpop.permute.xlu0 %52 }
  0x7b   :  { %vm57_vm1 = vcmp.eq.s32.totalorder %v53_v7, %v50_v6 }
  0x7c   :  { %v249_v9 = vsel %vm57_vm1, 1.0, %v331_v8  ;;  %v95_v20 = vpop.xlane.xlu1 %94 }
  0x7d   :  { %251 = vmatmul.msk.f32.vlgmr.msra.gmra.mxu0 %vm63_vm0, %v249_v9 }
  0x82   :  { %v56_v10 = vpop.permute.xlu0 %55 }
  0x83   :  { %vm58_vm2 = vcmp.eq.s32.totalorder %v56_v10, %v50_v6 }
  0x84   :  { %v250_v11 = vsel %vm58_vm2, 1.0, %v331_v8  ;;  %v98_v26 = vpop.xlane.xlu1 %97 }
  0x85   :  { %252 = vmatmul.msk.f32.vlgmr.msra.gmra.mxu1 %vm63_vm0, %v250_v11 }
  0xfa   :  { %v87_v16 = vpop.f32.mrf.mxu0 }
  0xfb   :  { %v99_v17 = vsel %vm63_vm0, %v87_v16, 0.0 }
  0xfc   :  { %100 = vadd.xlane.f32.xlu2 %v99_v17 }
 0x102   :  { %v90_v18 = vpop.f32.mrf.mxu1 }
 0x103   :  { %v102_v19 = vsel %vm63_vm0, %v90_v18, 0.0 }
 0x104   :  { %103 = vadd.xlane.f32.xlu2 %v102_v19  ;;  %v265_v19 = vld [vmem:[%s448_s6] ss:$0 sm:$0xff] }
 0x16f   :  { %v101_v21 = vpop.xlane.xlu2 %100 }
 0x170   :  { %v105_v22 = vadd.f32 %v101_v21, %v95_v20  ;;  %v266_v21 = vld [vmem:[%s447_s5] ss:$0 sm:$0xff] }
 0x172   :  { %v107_v23 = vmul.f32 0.03125, %v105_v22 }
 0x174   :  { %v398_v24 = vsub.f32 %v43_v12, %v107_v23  ;;  %v400_v25 = vsub.f32 %v87_v16, %v107_v23  ;;  %v264_v16 = vld [vmem:[%s446_s4] ss:$0 sm:$0xff]  ;;  %s333_s4 = smov [#allocation5]  }
 0x175   :  { %s234_s5 = sshll.u32 %s333_s4, 4  ;;  %s235_s5 = int_to_ptr.vmem [resolvable:$true] %s234_s5 }
 0x176   :  { %v121_v27 = vmul.f32 %v400_v25, %v400_v25  ;;  %v113_v28 = vmul.f32 %v398_v24, %v398_v24 }
 0x177   :  { %v104_v29 = vpop.xlane.xlu2 %103 }
 0x178   :  { %v106_v30 = vadd.f32 %v104_v29, %v98_v26  ;;  %v123_v31 = vsel %vm63_vm0, %v121_v27, 0.0  ;;  %v115_v32 = vsel %vm63_vm0, %v113_v28, 0.0 }
 0x179   :  { %124 = vadd.xlane.f32.xlu2 %v123_v31  ;;  %116 = vadd.xlane.f32.xlu0 %v115_v32 }
 0x17a   :  { %v108_v33 = vmul.f32 0.03125, %v106_v30 }
 0x17c   :  { %v408_v34 = vsub.f32 %v44_v14, %v108_v33  ;;  %v412_v36 = vsub.f32 %v90_v18, %v108_v33 }
 0x17e   :  { %v114_v35 = vmul.f32 %v408_v34, %v408_v34  ;;  %v122_v38 = vmul.f32 %v412_v36, %v412_v36 }
 0x180   :  { %v118_v37 = vsel %vm63_vm0, %v114_v35, 0.0  ;;  %v126_v39 = vsel %vm63_vm0, %v122_v38, 0.0 }
 0x181   :  { %119 = vadd.xlane.f32.xlu1 %v118_v37 }
 0x189   :  { %127 = vadd.xlane.f32.xlu1 %v126_v39 }
 0x1ec   :  { %v125_v40 = vpop.xlane.xlu2 %124  ;;  %v117_v41 = vpop.xlane.xlu0 %116 }
 0x1ed   :  { %v129_v42 = vadd.f32 %v125_v40, %v117_v41 }
 0x1ef   :  { %v131_v43 = vmul.f32 0.032258064, %v129_v42 }
 0x1f1   :  { %267 = vrsqrt.f32 %v131_v43  ;;  %vm140_vm3 = vcmp.eq.f32.partialorder %v131_v43, inf  ;;  %v143_v55 = vand.u32 2147483648, %v131_v43  ;;  %vm142_vm4 = vcmp.eq.f32.partialorder %v131_v43, 0.0 }
 0x1f4   :  { %v120_v44 = vpop.xlane.xlu1 %119 }
 0x1f7   :  { %v268_v45 = vpop.eup %267 }
 0x1f8   :  { %v134_v46 = vmul.f32 %v268_v45, %v131_v43 }
 0x1fa   :  { %v135_v47 = vmul.f32 %v268_v45, %v134_v46 }
 0x1fc   :  { %v136_v48 = vmul.f32 0.5, %v135_v47  ;;  %v128_v49 = vpop.xlane.xlu1 %127 }
 0x1fd   :  { %v130_v50 = vadd.f32 %v128_v49, %v120_v44 }
 0x1fe   :  { %v137_v51 = vsub.f32 1.5, %v136_v48 }
 0x1ff   :  { %v132_v52 = vmul.f32 0.032258064, %v130_v50 }
 0x200   :  { %v138_v53 = vmul.f32 %v268_v45, %v137_v51 }
 0x201   :  { %269 = vrsqrt.f32 %v132_v52  ;;  %vm152_vm5 = vcmp.eq.f32.partialorder %v132_v52, inf  ;;  %v155_v6 = vand.u32 2147483648, %v132_v52  ;;  %vm154_vm7 = vcmp.eq.f32.partialorder %v132_v52, 0.0 }
 0x202   :  { %v139_v54 = vmul.f32 %v138_v53, %v131_v43 }
 0x204   :  { %v141_v56 = vsel %vm140_vm3, %v131_v43, %v139_v54 }
 0x205   :  { %v144_v57 = vsel %vm142_vm4, %v143_v55, %v141_v56 }
 0x206   :  { %v157_v58 = vadd.f32 0.001, %v144_v57 }
 0x207   :  { %v270_v59 = vpop.eup %269 }
 0x208   :  { %v146_v60 = vmul.f32 %v270_v59, %v132_v52  ;;  %271 = vrcp.f32 %v157_v58  ;;  %v170_v5 = vand.u32 2147483648, %v157_v58  ;;  %v168_v8 = vand.u32 2147483647, %v157_v58 }
 0x209   :  { %vm164_vm8 = vweird.f32 %v157_v58 }
 0x20a   :  { %v147_v61 = vmul.f32 %v270_v59, %v146_v60  ;;  %v171_v12 = vor.u32 1.1754944e-38, %v170_v5  ;;  %vm169_vm10 = vcmp.eq.f32.partialorder %v168_v8, 8.507059e+37 }
 0x20c   :  { %v148_v62 = vmul.f32 0.5, %v147_v61 }
 0x20e   :  { %v272_v63 = vpop.eup %271  ;;  %v149_v0 = vsub.f32 1.5, %v148_v62 }
 0x20f   :  { %v160_v1 = vmul.f32 %v272_v63, %v157_v58  ;;  %vm165_vm6 = vweird.f32 %v272_v63 }
 0x210   :  { %v150_v2 = vmul.f32 %v270_v59, %v149_v0  ;;  %vm166_vm9 = vmor %vm164_vm8, %vm165_vm6 }
 0x211   :  { %v161_v3 = vsub.f32 1.0, %v160_v1 }
 0x212   :  { %v151_v4 = vmul.f32 %v150_v2, %v132_v52 }
 0x213   :  { %v162_v7 = vmul.f32 %v272_v63, %v161_v3 }
 0x214   :  { %v153_v9 = vsel %vm152_vm5, %v132_v52, %v151_v4 }
 0x215   :  { %v163_v10 = vadd.f32 %v272_v63, %v162_v7  ;;  %v156_v11 = vsel %vm154_vm7, %v155_v6, %v153_v9 }
 0x216   :  { %v158_v13 = vadd.f32 0.001, %v156_v11 }
 0x217   :  { %v167_v14 = vsel %vm166_vm9, %v272_v63, %v163_v10 }
 0x218   :  { %v172_v17 = vsel %vm169_vm10, %v171_v12, %v167_v14  ;;  %273 = vrcp.f32 %v158_v13  ;;  %v185_v30 = vand.u32 2147483648, %v158_v13  ;;  %v183_v32 = vand.u32 2147483647, %v158_v13 }
 0x219   :  { %v205_v18 = vmul.f32 %v172_v17, %v400_v25  ;;  %v189_v20 = vmul.f32 %v172_v17, %v398_v24  ;;  %vm179_vm12 = vweird.f32 %v158_v13 }
 0x21a   :  { %v186_v33 = vor.u32 1.1754944e-38, %v185_v30  ;;  %vm184_vm14 = vcmp.eq.f32.partialorder %v183_v32, 8.507059e+37 }
 0x21b   :  { %v211_v22 = vmul.f32 %v264_v16, %v205_v18  ;;  %v195_v23 = vmul.f32 %v263_v15, %v189_v20 }
 0x21d   :  { %v217_v26 = vadd.f32 %v265_v19, %v211_v22  ;;  %v201_v27 = vadd.f32 %v266_v21, %v195_v23 }
 0x21e   :  { %v274_v28 = vpop.eup %273 }
 0x21f   :  { %221 = vrot.lane.b32.xlu2 %v217_v26, %s332_s3  ;;  %v175_v29 = vmul.f32 %v274_v28, %v158_v13  ;;  %203 = vst.msk [vmem:[#allocation5] sm:$0xff] %vm63_vm0, %v201_v27  ;;  %vm180_vm11 = vweird.f32 %v274_v28 }
 0x220   :  { %vm181_vm13 = vmor %vm179_vm12, %vm180_vm11 }
 0x221   :  { %v176_v25 = vsub.f32 1.0, %v175_v29 }
 0x223   :  { %v177_v31 = vmul.f32 %v274_v28, %v176_v25 }
 0x225   :  { %v178_v24 = vadd.f32 %v274_v28, %v177_v31 }
 0x227   :  { %v182_v35 = vsel %vm181_vm13, %v274_v28, %v178_v24 }
 0x228   :  { %v187_v37 = vsel %vm184_vm14, %v186_v33, %v182_v35 }
 0x229   :  { %v206_v38 = vmul.f32 %v187_v37, %v412_v36  ;;  %v190_v39 = vmul.f32 %v187_v37, %v408_v34 }
 0x22b   :  { %v212_v40 = vmul.f32 %v264_v16, %v206_v38  ;;  %v196_v41 = vmul.f32 %v263_v15, %v190_v39 }
 0x22d   :  { %v218_v42 = vadd.f32 %v265_v19, %v212_v40  ;;  %v202_v43 = vadd.f32 %v266_v21, %v196_v41 }
 0x22f   :  { %223 = vrot.lane.b32.xlu1 %v218_v42, %s332_s3  ;;  %204 = vst.msk [vmem:[#allocation5 + $0x8] sm:$0xff] %vm63_vm0, %v202_v43 }
 0x279   :  { %v222_v44 = vpop.permute.xlu2 %221 }
 0x27a   :  { %228 = vst.msk [vmem:[#allocation5] sm:$0xff] %vm227_vm15, %v222_v44 }
 0x2a1   :  { %v224_v36 = vpop.permute.xlu1 %223 }
 0x2a2   :  { %229 = vst.msk [vmem:[#allocation5 + $0x8] sm:$0xff] %vm227_vm15, %v224_v36 }
 0x2a3   :  { %242 = dma.vmem_to_hbm [thread:$0]  %s235_s5, 256, %s237_s22, [#allocation4], %s328_s29, %s328_s29, %s329_s30  }
 0x2a4   :  { %325 = dma.done.wait [#allocation4], 256  }
 0x2a5   :  { %326 = vsyncadd [#allocation4], 4294967040 }
 0x2a6   :  { %247 = vsyncpa [#allocation3], 1 }
 0x2a7   :  { %248 = vsyncpa [#allocation4], 1 }

</bundles_post_ra>
